<compile_context>
chip_gen: v7x
topology: tpu7x:2x2x1
jax: 0.10.0
libtpu: 0.0.40
codegen_flags: <defaults>
</compile_context>

<pallas_src>
import functools
import numpy as np

import jax
import jax.numpy as jnp
from jax import lax
from jax.experimental import pallas as pl
from jax.experimental.pallas import tpu as pltpu


# ----------------------------- in-kernel helpers -----------------------------

def _silu(v):
    # exact SiLU; the reciprocal uses the (otherwise idle) EUP path.
    return v * pl.reciprocal(1.0 + jnp.exp(-v), approx=False)


def _group_norm(xc, gamma, beta, num_groups, eps=1e-5):
    """GroupNorm for one sample in (C, HW) layout.  gamma/beta: (C, 1)."""
    C, HW = xc.shape
    s = jnp.sum(xc, axis=1, keepdims=True)           # (C, 1)
    ss = jnp.sum(xc * xc, axis=1, keepdims=True)     # (C, 1)
    if num_groups == C:                               # per-channel groups (test config)
        mean = s * (1.0 / HW)
        msq = ss * (1.0 / HW)
    else:
        # General case: aggregate channel stats within each group using a small
        # trace-time constant matrix (no runtime iota/compare).
        cs = C // num_groups
        agg = (np.arange(C)[:, None] // cs == np.arange(C)[None, :] // cs)
        agg = jnp.asarray(agg.astype(np.float32))
        inv_cnt = 1.0 / float(HW * cs)
        mean = jnp.dot(agg, s, preferred_element_type=jnp.float32) * inv_cnt
        msq = jnp.dot(agg, ss, preferred_element_type=jnp.float32) * inv_cnt
    var = jnp.maximum(msq - mean * mean, 0.0)         # guard single-pass variance
    inv = lax.rsqrt(var + eps)
    return (xc - mean) * inv * gamma + beta


# --------------------------------- kernel ------------------------------------

def _resnet_block_kernel(groups1, groups2, shifts, identity_shortcut,
                         x_ref, temb_ref, mask_ref,
                         gn1_w, gn1_b, c1_w, c1_b,
                         tp_w, tp_b, gn2_w, gn2_b,
                         c2_w, c2_b, sc_w, sc_b,
                         out_ref):
    xr = x_ref[0].astype(jnp.float32)                 # (Cin, HW), lane-dense
    masks = mask_ref[...]                             # (9, HW) tap validity masks

    def im2col_3x3(h):
        # h: (C, HW) -> slab (9*C, HW); taps ordered (ky, kx) row-major to match
        # the reshaped conv weights.  Shifts are masked lane-rolls (XLU slot).
        parts = []
        for t, shift in enumerate(shifts):
            v = h if shift == 0 else pltpu.roll(h, shift=shift, axis=1)
            if t != 4:                                # center tap is always in-bounds
                v = v * masks[t:t + 1, :]
            parts.append(v)
        return jnp.concatenate(parts, axis=0)

    # --- norm1 + SiLU ---
    h = _silu(_group_norm(xr, gn1_w[...], gn1_b[...], groups1))

    # --- conv1 (3x3, pad 1): one fused (Cout, 9*Cin) @ (9*Cin, HW) MXU matmul ---
    h = jnp.dot(c1_w[...], im2col_3x3(h),
                preferred_element_type=jnp.float32) + c1_b[...]

    # --- time-embedding bias (emb_dim > 0, film=False -> gam == 1) ---
    t_col = temb_ref[0].astype(jnp.float32)           # (emb, 1), this sample only
    bet = jnp.dot(tp_w[...], _silu(t_col),
                  preferred_element_type=jnp.float32) + tp_b[...]   # (Cout, 1)
    h = h + bet

    # --- norm2 + SiLU ---
    h = _silu(_group_norm(h, gn2_w[...], gn2_b[...], groups2))

    # TODO(synk): nn.Dropout is identity in eval mode / p=0.0; no RNG applied.

    # --- conv2 (3x3, pad 1) ---
    h = jnp.dot(c2_w[...], im2col_3x3(h),
                preferred_element_type=jnp.float32) + c2_b[...]

    # --- shortcut ---
    if identity_shortcut:
        sc = xr                                       # nn.Identity: no matmul at all
    else:
        sc = jnp.dot(sc_w[...], xr,
                     preferred_element_type=jnp.float32) + sc_b[...]

    out_ref[0] = (h + sc).astype(out_ref.dtype)


# --------------------------------- wrapper -----------------------------------

def resnet_block_pallas(x_nchw, temb, params, *, groups1, groups2,
                        identity_shortcut=False):
    N, Cin, H, W = x_nchw.shape
    HW = H * W
    Cout = params["conv1_w"].shape[0]
    emb = temb.shape[-1]
    assert Cin % groups1 == 0 and Cout % groups2 == 0

    # Free layout changes only (reshape / trailing-axis expand): no transposes.
    x = x_nchw.reshape(N, Cin, HW).astype(jnp.float32)
    temb3 = temb.astype(jnp.float32)[:, :, None]      # (N, emb, 1)

    # 3x3 tap table: roll amount along the flattened HW axis + validity mask per
    # (dy, dx); tap order matches PyTorch (ky, kx) row-major kernel layout.
    ys, xs = np.divmod(np.arange(HW), W)
    offsets = [(dy, dx) for dy in (-1, 0, 1) for dx in (-1, 0, 1)]
    shifts = tuple(int((-(dy * W + dx)) % HW) for dy, dx in offsets)
    masks = np.stack([((ys + dy >= 0) & (ys + dy < H) &
                       (xs + dx >= 0) & (xs + dx < W)).astype(np.float32)
                      for dy, dx in offsets])          # (9, HW)
    masks = jnp.asarray(masks)

    def conv_mat(w_oihw):
        # (Cout, Cin, 3, 3) -> (Cout, 9*Cin) matching the im2col slab ordering.
        co, ci = w_oihw.shape[:2]
        w = jnp.transpose(w_oihw, (2, 3, 0, 1)).reshape(9, co, ci)   # (t, co, ci)
        return jnp.transpose(w, (1, 0, 2)).reshape(co, 9 * ci)

    weight_list = [
        params["gn1_w"], params["gn1_b"],
        conv_mat(params["conv1_w"]), params["conv1_b"],
        params["temb_w"], params["temb_b"],
        params["gn2_w"], params["gn2_b"],
        conv_mat(params["conv2_w"]), params["conv2_b"],
        params["sc_w"], params["sc_b"],
    ]
    weight_list = [w.astype(jnp.float32) for w in weight_list]

    def full_spec(a):
        nd = a.ndim
        return pl.BlockSpec(a.shape, lambda b, nd=nd: (0,) * nd)

    kernel = functools.partial(_resnet_block_kernel, groups1, groups2,
                               shifts, identity_shortcut)

    # grid=(N,) "parallel": one sample per TensorCore on v7x; on single-TC
    # v5e/v6e the extra grid step costs ~0.35us, negligible vs the layout wins.
    # TODO(synk): at real U-Net resolutions, tile H with a 1-row halo BlockSpec
    # (and set vmem_limit_bytes) instead of whole-sample blocks for v7x's 64 MiB.
    out = pl.pallas_call(
        kernel,
        out_shape=jax.ShapeDtypeStruct((N, Cout, HW), jnp.float32),
        grid_spec=pltpu.PrefetchScalarGridSpec(
            num_scalar_prefetch=0,
            grid=(N,),
            in_specs=[
                pl.BlockSpec((1, Cin, HW), lambda b: (b, 0, 0)),   # x, one sample
                pl.BlockSpec((1, emb, 1), lambda b: (b, 0, 0)),    # temb column
                full_spec(masks),                                  # tap masks
            ] + [full_spec(w) for w in weight_list],
            out_specs=pl.BlockSpec((1, Cout, HW), lambda b: (b, 0, 0)),
        ),
        compiler_params=pltpu.CompilerParams(
            dimension_semantics=("parallel",)),
    )(x, temb3, masks, *weight_list)

    return out.reshape(N, Cout, H, W)


# ------------------------- deterministic parameter init ----------------------

def init_params(key, Cin, Cout, emb):
    ks = jax.random.split(key, 12)

    def nrm(k, shape, scale):
        return scale * jax.random.normal(k, shape, jnp.float32)

    p = {
        "gn1_w": 1.0 + 0.1 * nrm(ks[0], (Cin, 1), 1.0),
        "gn1_b": 0.1 * nrm(ks[1], (Cin, 1), 1.0),
        "conv1_w": nrm(ks[2], (Cout, Cin, 3, 3), 0.1),   # OIHW (PyTorch layout)
        "conv1_b": nrm(ks[3], (Cout, 1), 0.1),
        "temb_w": nrm(ks[4], (Cout, emb), 0.1),          # nn.Linear weight (out, in)
        "temb_b": nrm(ks[5], (Cout, 1), 0.1),
        "gn2_w": 1.0 + 0.1 * nrm(ks[6], (Cout, 1), 1.0),
        "gn2_b": 0.1 * nrm(ks[7], (Cout, 1), 1.0),
        "conv2_w": nrm(ks[8], (Cout, Cout, 3, 3), 0.1),
        "conv2_b": nrm(ks[9], (Cout, 1), 0.1),
    }
    if Cin != Cout:
        p["sc_w"] = nrm(ks[10], (Cout, Cin), 0.1)        # 1x1 conv as (Cout, Cin)
        p["sc_b"] = nrm(ks[11], (Cout, 1), 0.1)
    else:
        p["sc_w"] = jnp.eye(Cin, dtype=jnp.float32)      # unused (identity shortcut)
        p["sc_b"] = jnp.zeros((Cout, 1), jnp.float32)
    return p


# ----------------------------- pure-JAX reference ----------------------------

def reference(x, temb, p, groups1, groups2, identity_shortcut):
    def gn(v, gamma, beta, G, eps=1e-5):
        N, C, H, W = v.shape
        vg = v.reshape(N, G, C // G, H * W)
        mean = vg.mean(axis=(2, 3), keepdims=True)
        var = vg.var(axis=(2, 3), keepdims=True)
        vn = ((vg - mean) / jnp.sqrt(var + eps)).reshape(N, C, H, W)
        return vn * gamma.reshape(1, C, 1, 1) + beta.reshape(1, C, 1, 1)

    def conv3(v, w_oihw, b):
        out = lax.conv_general_dilated(
            v, w_oihw, (1, 1), [(1, 1), (1, 1)],
            dimension_numbers=("NCHW", "OIHW", "NCHW"),
            precision=lax.Precision.HIGHEST)
        return out + b.reshape(1, -1, 1, 1)

    h = jax.nn.silu(gn(x, p["gn1_w"], p["gn1_b"], groups1))
    h = conv3(h, p["conv1_w"], p["conv1_b"])
    bet = jax.nn.silu(temb) @ p["temb_w"].T + p["temb_b"].reshape(1, -1)
    h = h + bet[:, :, None, None]
    h = jax.nn.silu(gn(h, p["gn2_w"], p["gn2_b"], groups2))
    h = conv3(h, p["conv2_w"], p["conv2_b"])
    if identity_shortcut:
        sc = x
    else:
        sc = jnp.einsum("nchw,dc->ndhw", x, p["sc_w"],
                        precision=lax.Precision.HIGHEST) \
            + p["sc_b"].reshape(1, -1, 1, 1)
    return h + sc


# ----------------------------------- main -------------------------------------

if __name__ == "__main__":
    N, Cin, Cout, H, W, emb = 2, 4, 8, 16, 16, 32
    groups1 = min(32, Cin)     # GroupNorm(min(C, 32), C) as in NormalizationLayer
    groups2 = min(32, Cout)
    identity = (Cin == Cout)

    key = jax.random.PRNGKey(0)
    kx, kt, kp = jax.random.split(key, 3)
    x = jax.random.normal(kx, (N, Cin, H, W), jnp.float32)
    temb = jax.random.normal(kt, (N, emb), jnp.float32)
    params = init_params(kp, Cin, Cout, emb)

    out = resnet_block_pallas(x, temb, params, groups1=groups1, groups2=groups2,
                              identity_shortcut=identity)
    out = jax.block_until_ready(out)

    ref = reference(x, temb, params, groups1, groups2, identity)
    assert out.shape == (N, Cout, H, W)
    err = float(np.max(np.abs(np.asarray(out) - np.asarray(ref))))
    assert np.allclose(np.asarray(out), np.asarray(ref), atol=5e-3, rtol=5e-3), err

    print("KERNEL_OK")
</pallas_src>

<mosaic_0001>
module attributes {stable_mosaic.version = 11 : i64} {
  func.func @_resnet_block_kernel(%arg0: i32, %arg1: memref<1x4x256xf32, #tpu.memory_space<vmem>>, %arg2: memref<1x32x1xf32, #tpu.memory_space<vmem>>, %arg3: memref<9x256xf32, #tpu.memory_space<vmem>>, %arg4: memref<4x1xf32, #tpu.memory_space<vmem>>, %arg5: memref<4x1xf32, #tpu.memory_space<vmem>>, %arg6: memref<8x36xf32, #tpu.memory_space<vmem>>, %arg7: memref<8x1xf32, #tpu.memory_space<vmem>>, %arg8: memref<8x32xf32, #tpu.memory_space<vmem>>, %arg9: memref<8x1xf32, #tpu.memory_space<vmem>>, %arg10: memref<8x1xf32, #tpu.memory_space<vmem>>, %arg11: memref<8x1xf32, #tpu.memory_space<vmem>>, %arg12: memref<8x72xf32, #tpu.memory_space<vmem>>, %arg13: memref<8x1xf32, #tpu.memory_space<vmem>>, %arg14: memref<8x4xf32, #tpu.memory_space<vmem>>, %arg15: memref<8x1xf32, #tpu.memory_space<vmem>>, %arg16: memref<1x8x256xf32, #tpu.memory_space<vmem>>) attributes {dimension_semantics = [#tpu.dimension_semantics<parallel>], iteration_bounds = array<i64: 2>, scalar_prefetch = 0 : i64, scratch_operands = 0 : i64, tpu.core_type = #tpu.core_type<tc>, window_params = [{transform_indices = @transform_0, window_bounds = array<i64: 1, 4, 256>}, {transform_indices = @transform_1, window_bounds = array<i64: 1, 32, 1>}, {pipeline_mode = #tpu.pipeline_mode<synchronous>, transform_indices = @transform_2, window_bounds = array<i64: 9, 256>}, {pipeline_mode = #tpu.pipeline_mode<synchronous>, transform_indices = @transform_3, window_bounds = array<i64: 4, 1>}, {pipeline_mode = #tpu.pipeline_mode<synchronous>, transform_indices = @transform_4, window_bounds = array<i64: 4, 1>}, {pipeline_mode = #tpu.pipeline_mode<synchronous>, transform_indices = @transform_5, window_bounds = array<i64: 8, 36>}, {pipeline_mode = #tpu.pipeline_mode<synchronous>, transform_indices = @transform_6, window_bounds = array<i64: 8, 1>}, {pipeline_mode = #tpu.pipeline_mode<synchronous>, transform_indices = @transform_7, window_bounds = array<i64: 8, 32>}, {pipeline_mode = #tpu.pipeline_mode<synchronous>, transform_indices = @transform_8, window_bounds = array<i64: 8, 1>}, {pipeline_mode = #tpu.pipeline_mode<synchronous>, transform_indices = @transform_9, window_bounds = array<i64: 8, 1>}, {pipeline_mode = #tpu.pipeline_mode<synchronous>, transform_indices = @transform_10, window_bounds = array<i64: 8, 1>}, {pipeline_mode = #tpu.pipeline_mode<synchronous>, transform_indices = @transform_11, window_bounds = array<i64: 8, 72>}, {pipeline_mode = #tpu.pipeline_mode<synchronous>, transform_indices = @transform_12, window_bounds = array<i64: 8, 1>}, {pipeline_mode = #tpu.pipeline_mode<synchronous>, transform_indices = @transform_13, window_bounds = array<i64: 8, 4>}, {pipeline_mode = #tpu.pipeline_mode<synchronous>, transform_indices = @transform_14, window_bounds = array<i64: 8, 1>}, {transform_indices = @transform_15, window_bounds = array<i64: 1, 8, 256>}]} {
    %c0 = arith.constant 0 : index
    %c0_0 = arith.constant 0 : index
    %c0_1 = arith.constant 0 : index
    %0 = vector.load %arg1[%c0, %c0_0, %c0_1] : memref<1x4x256xf32, #tpu.memory_space<vmem>>, vector<1x4x256xf32>
    %1 = vector.shape_cast %0 : vector<1x4x256xf32> to vector<4x256xf32>
    %c0_2 = arith.constant 0 : index
    %c0_3 = arith.constant 0 : index
    %2 = vector.load %arg3[%c0_2, %c0_3] : memref<9x256xf32, #tpu.memory_space<vmem>>, vector<9x256xf32>
    %c0_4 = arith.constant 0 : index
    %c0_5 = arith.constant 0 : index
    %3 = vector.load %arg4[%c0_4, %c0_5] : memref<4x1xf32, #tpu.memory_space<vmem>>, vector<4x1xf32>
    %c0_6 = arith.constant 0 : index
    %c0_7 = arith.constant 0 : index
    %4 = vector.load %arg5[%c0_6, %c0_7] : memref<4x1xf32, #tpu.memory_space<vmem>>, vector<4x1xf32>
    %cst = arith.constant dense<0.000000e+00> : vector<4xf32>
    %5 = vector.multi_reduction <add>, %1, %cst [1] : vector<4x256xf32> to vector<4xf32>
    %6 = vector.shape_cast %5 : vector<4xf32> to vector<4x1xf32>
    %7 = arith.mulf %1, %1 : vector<4x256xf32>
    %cst_8 = arith.constant dense<0.000000e+00> : vector<4xf32>
    %8 = vector.multi_reduction <add>, %7, %cst_8 [1] : vector<4x256xf32> to vector<4xf32>
    %9 = vector.shape_cast %8 : vector<4xf32> to vector<4x1xf32>
    %cst_9 = arith.constant 3.906250e-03 : f32
    %10 = vector.broadcast %cst_9 : f32 to vector<4x1xf32>
    %11 = arith.mulf %6, %10 : vector<4x1xf32>
    %cst_10 = arith.constant 3.906250e-03 : f32
    %12 = vector.broadcast %cst_10 : f32 to vector<4x1xf32>
    %13 = arith.mulf %9, %12 : vector<4x1xf32>
    %14 = arith.mulf %11, %11 : vector<4x1xf32>
    %15 = arith.subf %13, %14 : vector<4x1xf32>
    %cst_11 = arith.constant 0.000000e+00 : f32
    %16 = vector.broadcast %cst_11 : f32 to vector<4x1xf32>
    %17 = arith.maximumf %15, %16 : vector<4x1xf32>
    %cst_12 = arith.constant 9.99999974E-6 : f32
    %18 = vector.broadcast %cst_12 : f32 to vector<4x1xf32>
    %19 = arith.addf %17, %18 : vector<4x1xf32>
    %20 = math.rsqrt %19 : vector<4x1xf32>
    %21 = vector.broadcast %11 : vector<4x1xf32> to vector<4x256xf32>
    %22 = arith.subf %1, %21 : vector<4x256xf32>
    %23 = vector.broadcast %20 : vector<4x1xf32> to vector<4x256xf32>
    %24 = arith.mulf %22, %23 : vector<4x256xf32>
    %25 = vector.broadcast %3 : vector<4x1xf32> to vector<4x256xf32>
    %26 = arith.mulf %24, %25 : vector<4x256xf32>
    %27 = vector.broadcast %4 : vector<4x1xf32> to vector<4x256xf32>
    %28 = arith.addf %26, %27 : vector<4x256xf32>
    %cst_13 = arith.constant 0.000000e+00 : f32
    %29 = vector.broadcast %cst_13 : f32 to vector<4x256xf32>
    %30 = arith.subf %29, %28 : vector<4x256xf32>
    %31 = math.exp %30 : vector<4x256xf32>
    %cst_14 = arith.constant 1.000000e+00 : f32
    %32 = vector.broadcast %cst_14 : f32 to vector<4x256xf32>
    %33 = arith.addf %32, %31 : vector<4x256xf32>
    %34 = tpu.reciprocal %33 : vector<4x256xf32> -> vector<4x256xf32>
    %35 = arith.mulf %28, %34 : vector<4x256xf32>
    %c0_15 = arith.constant 0 : index
    %c0_16 = arith.constant 0 : index
    %36 = vector.load %arg6[%c0_15, %c0_16] : memref<8x36xf32, #tpu.memory_space<vmem>>, vector<8x36xf32>
    %c17_i32 = arith.constant 17 : i32
    %37 = tpu.dynamic_rotate %35 by %c17_i32 dim 1 : vector<4x256xf32>, i32 -> vector<4x256xf32>
    %38 = vector.extract_strided_slice %2 {offsets = [0, 0], sizes = [1, 256], strides = [1, 1]} : vector<9x256xf32> to vector<1x256xf32>
    %39 = vector.broadcast %38 : vector<1x256xf32> to vector<4x256xf32>
    %40 = arith.mulf %37, %39 : vector<4x256xf32>
    %c16_i32 = arith.constant 16 : i32
    %41 = tpu.dynamic_rotate %35 by %c16_i32 dim 1 : vector<4x256xf32>, i32 -> vector<4x256xf32>
    %42 = vector.extract_strided_slice %2 {offsets = [1, 0], sizes = [1, 256], strides = [1, 1]} : vector<9x256xf32> to vector<1x256xf32>
    %43 = vector.broadcast %42 : vector<1x256xf32> to vector<4x256xf32>
    %44 = arith.mulf %41, %43 : vector<4x256xf32>
    %c15_i32 = arith.constant 15 : i32
    %45 = tpu.dynamic_rotate %35 by %c15_i32 dim 1 : vector<4x256xf32>, i32 -> vector<4x256xf32>
    %46 = vector.extract_strided_slice %2 {offsets = [2, 0], sizes = [1, 256], strides = [1, 1]} : vector<9x256xf32> to vector<1x256xf32>
    %47 = vector.broadcast %46 : vector<1x256xf32> to vector<4x256xf32>
    %48 = arith.mulf %45, %47 : vector<4x256xf32>
    %c1_i32 = arith.constant 1 : i32
    %49 = tpu.dynamic_rotate %35 by %c1_i32 dim 1 : vector<4x256xf32>, i32 -> vector<4x256xf32>
    %50 = vector.extract_strided_slice %2 {offsets = [3, 0], sizes = [1, 256], strides = [1, 1]} : vector<9x256xf32> to vector<1x256xf32>
    %51 = vector.broadcast %50 : vector<1x256xf32> to vector<4x256xf32>
    %52 = arith.mulf %49, %51 : vector<4x256xf32>
    %c255_i32 = arith.constant 255 : i32
    %53 = tpu.dynamic_rotate %35 by %c255_i32 dim 1 : vector<4x256xf32>, i32 -> vector<4x256xf32>
    %54 = vector.extract_strided_slice %2 {offsets = [5, 0], sizes = [1, 256], strides = [1, 1]} : vector<9x256xf32> to vector<1x256xf32>
    %55 = vector.broadcast %54 : vector<1x256xf32> to vector<4x256xf32>
    %56 = arith.mulf %53, %55 : vector<4x256xf32>
    %c241_i32 = arith.constant 241 : i32
    %57 = tpu.dynamic_rotate %35 by %c241_i32 dim 1 : vector<4x256xf32>, i32 -> vector<4x256xf32>
    %58 = vector.extract_strided_slice %2 {offsets = [6, 0], sizes = [1, 256], strides = [1, 1]} : vector<9x256xf32> to vector<1x256xf32>
    %59 = vector.broadcast %58 : vector<1x256xf32> to vector<4x256xf32>
    %60 = arith.mulf %57, %59 : vector<4x256xf32>
    %c240_i32 = arith.constant 240 : i32
    %61 = tpu.dynamic_rotate %35 by %c240_i32 dim 1 : vector<4x256xf32>, i32 -> vector<4x256xf32>
    %62 = vector.extract_strided_slice %2 {offsets = [7, 0], sizes = [1, 256], strides = [1, 1]} : vector<9x256xf32> to vector<1x256xf32>
    %63 = vector.broadcast %62 : vector<1x256xf32> to vector<4x256xf32>
    %64 = arith.mulf %61, %63 : vector<4x256xf32>
    %c239_i32 = arith.constant 239 : i32
    %65 = tpu.dynamic_rotate %35 by %c239_i32 dim 1 : vector<4x256xf32>, i32 -> vector<4x256xf32>
    %66 = vector.extract_strided_slice %2 {offsets = [8, 0], sizes = [1, 256], strides = [1, 1]} : vector<9x256xf32> to vector<1x256xf32>
    %67 = vector.broadcast %66 : vector<1x256xf32> to vector<4x256xf32>
    %68 = arith.mulf %65, %67 : vector<4x256xf32>
    %69 = tpu.concatenate %40, %44, %48, %52, %35, %56, %60, %64, %68 in 0 : vector<4x256xf32>, vector<4x256xf32>, vector<4x256xf32>, vector<4x256xf32>, vector<4x256xf32>, vector<4x256xf32>, vector<4x256xf32>, vector<4x256xf32>, vector<4x256xf32> -> vector<36x256xf32>
    %cst_17 = arith.constant dense<0.000000e+00> : vector<8x256xf32>
    %70 = tpu.matmul %36, %69, %cst_17 {dimension_numbers = #tpu.dot_dimension_numbers<[1], [0], [0], [1], [0, 0, 1, 1], [], []>} : vector<8x36xf32>, vector<36x256xf32>, vector<8x256xf32> -> vector<8x256xf32>
    %c0_18 = arith.constant 0 : index
    %c0_19 = arith.constant 0 : index
    %71 = vector.load %arg7[%c0_18, %c0_19] : memref<8x1xf32, #tpu.memory_space<vmem>>, vector<8x1xf32>
    %72 = vector.broadcast %71 : vector<8x1xf32> to vector<8x256xf32>
    %73 = arith.addf %70, %72 : vector<8x256xf32>
    %c0_20 = arith.constant 0 : index
    %c0_21 = arith.constant 0 : index
    %c0_22 = arith.constant 0 : index
    %74 = vector.load %arg2[%c0_20, %c0_21, %c0_22] : memref<1x32x1xf32, #tpu.memory_space<vmem>>, vector<1x32x1xf32>
    %75 = vector.shape_cast %74 : vector<1x32x1xf32> to vector<32x1xf32>
    %c0_23 = arith.constant 0 : index
    %c0_24 = arith.constant 0 : index
    %76 = vector.load %arg8[%c0_23, %c0_24] : memref<8x32xf32, #tpu.memory_space<vmem>>, vector<8x32xf32>
    %cst_25 = arith.constant 0.000000e+00 : f32
    %77 = vector.broadcast %cst_25 : f32 to vector<32x1xf32>
    %78 = arith.subf %77, %75 : vector<32x1xf32>
    %79 = math.exp %78 : vector<32x1xf32>
    %cst_26 = arith.constant 1.000000e+00 : f32
    %80 = vector.broadcast %cst_26 : f32 to vector<32x1xf32>
    %81 = arith.addf %80, %79 : vector<32x1xf32>
    %82 = tpu.reciprocal %81 : vector<32x1xf32> -> vector<32x1xf32>
    %83 = arith.mulf %75, %82 : vector<32x1xf32>
    %cst_27 = arith.constant dense<0.000000e+00> : vector<8x1xf32>
    %84 = tpu.matmul %76, %83, %cst_27 {dimension_numbers = #tpu.dot_dimension_numbers<[1], [0], [0], [1], [0, 0, 1, 1], [], []>} : vector<8x32xf32>, vector<32x1xf32>, vector<8x1xf32> -> vector<8x1xf32>
    %c0_28 = arith.constant 0 : index
    %c0_29 = arith.constant 0 : index
    %85 = vector.load %arg9[%c0_28, %c0_29] : memref<8x1xf32, #tpu.memory_space<vmem>>, vector<8x1xf32>
    %86 = arith.addf %84, %85 : vector<8x1xf32>
    %87 = vector.broadcast %86 : vector<8x1xf32> to vector<8x256xf32>
    %88 = arith.addf %73, %87 : vector<8x256xf32>
    %c0_30 = arith.constant 0 : index
    %c0_31 = arith.constant 0 : index
    %89 = vector.load %arg10[%c0_30, %c0_31] : memref<8x1xf32, #tpu.memory_space<vmem>>, vector<8x1xf32>
    %c0_32 = arith.constant 0 : index
    %c0_33 = arith.constant 0 : index
    %90 = vector.load %arg11[%c0_32, %c0_33] : memref<8x1xf32, #tpu.memory_space<vmem>>, vector<8x1xf32>
    %cst_34 = arith.constant dense<0.000000e+00> : vector<8xf32>
    %91 = vector.multi_reduction <add>, %88, %cst_34 [1] : vector<8x256xf32> to vector<8xf32>
    %92 = vector.shape_cast %91 : vector<8xf32> to vector<8x1xf32>
    %93 = arith.mulf %88, %88 : vector<8x256xf32>
    %cst_35 = arith.constant dense<0.000000e+00> : vector<8xf32>
    %94 = vector.multi_reduction <add>, %93, %cst_35 [1] : vector<8x256xf32> to vector<8xf32>
    %95 = vector.shape_cast %94 : vector<8xf32> to vector<8x1xf32>
    %cst_36 = arith.constant 3.906250e-03 : f32
    %96 = vector.broadcast %cst_36 : f32 to vector<8x1xf32>
    %97 = arith.mulf %92, %96 : vector<8x1xf32>
    %cst_37 = arith.constant 3.906250e-03 : f32
    %98 = vector.broadcast %cst_37 : f32 to vector<8x1xf32>
    %99 = arith.mulf %95, %98 : vector<8x1xf32>
    %100 = arith.mulf %97, %97 : vector<8x1xf32>
    %101 = arith.subf %99, %100 : vector<8x1xf32>
    %cst_38 = arith.constant 0.000000e+00 : f32
    %102 = vector.broadcast %cst_38 : f32 to vector<8x1xf32>
    %103 = arith.maximumf %101, %102 : vector<8x1xf32>
    %cst_39 = arith.constant 9.99999974E-6 : f32
    %104 = vector.broadcast %cst_39 : f32 to vector<8x1xf32>
    %105 = arith.addf %103, %104 : vector<8x1xf32>
    %106 = math.rsqrt %105 : vector<8x1xf32>
    %107 = vector.broadcast %97 : vector<8x1xf32> to vector<8x256xf32>
    %108 = arith.subf %88, %107 : vector<8x256xf32>
    %109 = vector.broadcast %106 : vector<8x1xf32> to vector<8x256xf32>
    %110 = arith.mulf %108, %109 : vector<8x256xf32>
    %111 = vector.broadcast %89 : vector<8x1xf32> to vector<8x256xf32>
    %112 = arith.mulf %110, %111 : vector<8x256xf32>
    %113 = vector.broadcast %90 : vector<8x1xf32> to vector<8x256xf32>
    %114 = arith.addf %112, %113 : vector<8x256xf32>
    %cst_40 = arith.constant 0.000000e+00 : f32
    %115 = vector.broadcast %cst_40 : f32 to vector<8x256xf32>
    %116 = arith.subf %115, %114 : vector<8x256xf32>
    %117 = math.exp %116 : vector<8x256xf32>
    %cst_41 = arith.constant 1.000000e+00 : f32
    %118 = vector.broadcast %cst_41 : f32 to vector<8x256xf32>
    %119 = arith.addf %118, %117 : vector<8x256xf32>
    %120 = tpu.reciprocal %119 : vector<8x256xf32> -> vector<8x256xf32>
    %121 = arith.mulf %114, %120 : vector<8x256xf32>
    %c0_42 = arith.constant 0 : index
    %c0_43 = arith.constant 0 : index
    %122 = vector.load %arg12[%c0_42, %c0_43] : memref<8x72xf32, #tpu.memory_space<vmem>>, vector<8x72xf32>
    %c17_i32_44 = arith.constant 17 : i32
    %123 = tpu.dynamic_rotate %121 by %c17_i32_44 dim 1 : vector<8x256xf32>, i32 -> vector<8x256xf32>
    %124 = vector.extract_strided_slice %2 {offsets = [0, 0], sizes = [1, 256], strides = [1, 1]} : vector<9x256xf32> to vector<1x256xf32>
    %125 = vector.broadcast %124 : vector<1x256xf32> to vector<8x256xf32>
    %126 = arith.mulf %123, %125 : vector<8x256xf32>
    %c16_i32_45 = arith.constant 16 : i32
    %127 = tpu.dynamic_rotate %121 by %c16_i32_45 dim 1 : vector<8x256xf32>, i32 -> vector<8x256xf32>
    %128 = vector.extract_strided_slice %2 {offsets = [1, 0], sizes = [1, 256], strides = [1, 1]} : vector<9x256xf32> to vector<1x256xf32>
    %129 = vector.broadcast %128 : vector<1x256xf32> to vector<8x256xf32>
    %130 = arith.mulf %127, %129 : vector<8x256xf32>
    %c15_i32_46 = arith.constant 15 : i32
    %131 = tpu.dynamic_rotate %121 by %c15_i32_46 dim 1 : vector<8x256xf32>, i32 -> vector<8x256xf32>
    %132 = vector.extract_strided_slice %2 {offsets = [2, 0], sizes = [1, 256], strides = [1, 1]} : vector<9x256xf32> to vector<1x256xf32>
    %133 = vector.broadcast %132 : vector<1x256xf32> to vector<8x256xf32>
    %134 = arith.mulf %131, %133 : vector<8x256xf32>
    %c1_i32_47 = arith.constant 1 : i32
    %135 = tpu.dynamic_rotate %121 by %c1_i32_47 dim 1 : vector<8x256xf32>, i32 -> vector<8x256xf32>
    %136 = vector.extract_strided_slice %2 {offsets = [3, 0], sizes = [1, 256], strides = [1, 1]} : vector<9x256xf32> to vector<1x256xf32>
    %137 = vector.broadcast %136 : vector<1x256xf32> to vector<8x256xf32>
    %138 = arith.mulf %135, %137 : vector<8x256xf32>
    %c255_i32_48 = arith.constant 255 : i32
    %139 = tpu.dynamic_rotate %121 by %c255_i32_48 dim 1 : vector<8x256xf32>, i32 -> vector<8x256xf32>
    %140 = vector.extract_strided_slice %2 {offsets = [5, 0], sizes = [1, 256], strides = [1, 1]} : vector<9x256xf32> to vector<1x256xf32>
    %141 = vector.broadcast %140 : vector<1x256xf32> to vector<8x256xf32>
    %142 = arith.mulf %139, %141 : vector<8x256xf32>
    %c241_i32_49 = arith.constant 241 : i32
    %143 = tpu.dynamic_rotate %121 by %c241_i32_49 dim 1 : vector<8x256xf32>, i32 -> vector<8x256xf32>
    %144 = vector.extract_strided_slice %2 {offsets = [6, 0], sizes = [1, 256], strides = [1, 1]} : vector<9x256xf32> to vector<1x256xf32>
    %145 = vector.broadcast %144 : vector<1x256xf32> to vector<8x256xf32>
    %146 = arith.mulf %143, %145 : vector<8x256xf32>
    %c240_i32_50 = arith.constant 240 : i32
    %147 = tpu.dynamic_rotate %121 by %c240_i32_50 dim 1 : vector<8x256xf32>, i32 -> vector<8x256xf32>
    %148 = vector.extract_strided_slice %2 {offsets = [7, 0], sizes = [1, 256], strides = [1, 1]} : vector<9x256xf32> to vector<1x256xf32>
    %149 = vector.broadcast %148 : vector<1x256xf32> to vector<8x256xf32>
    %150 = arith.mulf %147, %149 : vector<8x256xf32>
    %c239_i32_51 = arith.constant 239 : i32
    %151 = tpu.dynamic_rotate %121 by %c239_i32_51 dim 1 : vector<8x256xf32>, i32 -> vector<8x256xf32>
    %152 = vector.extract_strided_slice %2 {offsets = [8, 0], sizes = [1, 256], strides = [1, 1]} : vector<9x256xf32> to vector<1x256xf32>
    %153 = vector.broadcast %152 : vector<1x256xf32> to vector<8x256xf32>
    %154 = arith.mulf %151, %153 : vector<8x256xf32>
    %155 = tpu.concatenate %126, %130, %134, %138, %121, %142, %146, %150, %154 in 0 : vector<8x256xf32>, vector<8x256xf32>, vector<8x256xf32>, vector<8x256xf32>, vector<8x256xf32>, vector<8x256xf32>, vector<8x256xf32>, vector<8x256xf32>, vector<8x256xf32> -> vector<72x256xf32>
    %cst_52 = arith.constant dense<0.000000e+00> : vector<8x256xf32>
    %156 = tpu.matmul %122, %155, %cst_52 {dimension_numbers = #tpu.dot_dimension_numbers<[1], [0], [0], [1], [0, 0, 1, 1], [], []>} : vector<8x72xf32>, vector<72x256xf32>, vector<8x256xf32> -> vector<8x256xf32>
    %c0_53 = arith.constant 0 : index
    %c0_54 = arith.constant 0 : index
    %157 = vector.load %arg13[%c0_53, %c0_54] : memref<8x1xf32, #tpu.memory_space<vmem>>, vector<8x1xf32>
    %158 = vector.broadcast %157 : vector<8x1xf32> to vector<8x256xf32>
    %159 = arith.addf %156, %158 : vector<8x256xf32>
    %c0_55 = arith.constant 0 : index
    %c0_56 = arith.constant 0 : index
    %160 = vector.load %arg14[%c0_55, %c0_56] : memref<8x4xf32, #tpu.memory_space<vmem>>, vector<8x4xf32>
    %cst_57 = arith.constant dense<0.000000e+00> : vector<8x256xf32>
    %161 = tpu.matmul %160, %1, %cst_57 {dimension_numbers = #tpu.dot_dimension_numbers<[1], [0], [0], [1], [0, 0, 1, 1], [], []>} : vector<8x4xf32>, vector<4x256xf32>, vector<8x256xf32> -> vector<8x256xf32>
    %c0_58 = arith.constant 0 : index
    %c0_59 = arith.constant 0 : index
    %162 = vector.load %arg15[%c0_58, %c0_59] : memref<8x1xf32, #tpu.memory_space<vmem>>, vector<8x1xf32>
    %163 = vector.broadcast %162 : vector<8x1xf32> to vector<8x256xf32>
    %164 = arith.addf %161, %163 : vector<8x256xf32>
    %165 = arith.addf %159, %164 : vector<8x256xf32>
    %c0_60 = arith.constant 0 : index
    %c0_61 = arith.constant 0 : index
    %c0_62 = arith.constant 0 : index
    %166 = vector.load %arg16[%c0_60, %c0_61, %c0_62] : memref<1x8x256xf32, #tpu.memory_space<vmem>>, vector<1x8x256xf32>
    %167 = vector.shape_cast %166 : vector<1x8x256xf32> to vector<8x256xf32>
    %168 = vector.shape_cast %165 : vector<8x256xf32> to vector<1x8x256xf32>
    tpu.vector_store %arg16[%c0_60, %c0_61, %c0_62], %168 {strides = array<i32>} : memref<1x8x256xf32, #tpu.memory_space<vmem>>, vector<1x8x256xf32>,
    return
  }
  func.func @transform_0(%arg0: i32) -> (i32, i32, i32) {
    %c0_i32 = arith.constant 0 : i32
    %c0_i32_0 = arith.constant 0 : i32
    %c0_i32_1 = arith.constant 0 : i32
    return %arg0, %c0_i32, %c0_i32_0 : i32, i32, i32
  }
  func.func @transform_1(%arg0: i32) -> (i32, i32, i32) {
    %c0_i32 = arith.constant 0 : i32
    %c0_i32_0 = arith.constant 0 : i32
    %c0_i32_1 = arith.constant 0 : i32
    return %arg0, %c0_i32, %c0_i32_0 : i32, i32, i32
  }
  func.func @transform_2(%arg0: i32) -> (i32, i32) {
    %c0_i32 = arith.constant 0 : i32
    %c0_i32_0 = arith.constant 0 : i32
    %c0_i32_1 = arith.constant 0 : i32
    return %c0_i32, %c0_i32_0 : i32, i32
  }
  func.func @transform_3(%arg0: i32) -> (i32, i32) {
    %c0_i32 = arith.constant 0 : i32
    %c0_i32_0 = arith.constant 0 : i32
    %c0_i32_1 = arith.constant 0 : i32
    return %c0_i32, %c0_i32_0 : i32, i32
  }
  func.func @transform_4(%arg0: i32) -> (i32, i32) {
    %c0_i32 = arith.constant 0 : i32
    %c0_i32_0 = arith.constant 0 : i32
    %c0_i32_1 = arith.constant 0 : i32
    return %c0_i32, %c0_i32_0 : i32, i32
  }
  func.func @transform_5(%arg0: i32) -> (i32, i32) {
    %c0_i32 = arith.constant 0 : i32
    %c0_i32_0 = arith.constant 0 : i32
    %c0_i32_1 = arith.constant 0 : i32
    return %c0_i32, %c0_i32_0 : i32, i32
  }
  func.func @transform_6(%arg0: i32) -> (i32, i32) {
    %c0_i32 = arith.constant 0 : i32
    %c0_i32_0 = arith.constant 0 : i32
    %c0_i32_1 = arith.constant 0 : i32
    return %c0_i32, %c0_i32_0 : i32, i32
  }
  func.func @transform_7(%arg0: i32) -> (i32, i32) {
    %c0_i32 = arith.constant 0 : i32
    %c0_i32_0 = arith.constant 0 : i32
    %c0_i32_1 = arith.constant 0 : i32
    return %c0_i32, %c0_i32_0 : i32, i32
  }
  func.func @transform_8(%arg0: i32) -> (i32, i32) {
    %c0_i32 = arith.constant 0 : i32
    %c0_i32_0 = arith.constant 0 : i32
    %c0_i32_1 = arith.constant 0 : i32
    return %c0_i32, %c0_i32_0 : i32, i32
  }
  func.func @transform_9(%arg0: i32) -> (i32, i32) {
    %c0_i32 = arith.constant 0 : i32
    %c0_i32_0 = arith.constant 0 : i32
    %c0_i32_1 = arith.constant 0 : i32
    return %c0_i32, %c0_i32_0 : i32, i32
  }
  func.func @transform_10(%arg0: i32) -> (i32, i32) {
    %c0_i32 = arith.constant 0 : i32
    %c0_i32_0 = arith.constant 0 : i32
    %c0_i32_1 = arith.constant 0 : i32
    return %c0_i32, %c0_i32_0 : i32, i32
  }
  func.func @transform_11(%arg0: i32) -> (i32, i32) {
    %c0_i32 = arith.constant 0 : i32
    %c0_i32_0 = arith.constant 0 : i32
    %c0_i32_1 = arith.constant 0 : i32
    return %c0_i32, %c0_i32_0 : i32, i32
  }
  func.func @transform_12(%arg0: i32) -> (i32, i32) {
    %c0_i32 = arith.constant 0 : i32
    %c0_i32_0 = arith.constant 0 : i32
    %c0_i32_1 = arith.constant 0 : i32
    return %c0_i32, %c0_i32_0 : i32, i32
  }
  func.func @transform_13(%arg0: i32) -> (i32, i32) {
    %c0_i32 = arith.constant 0 : i32
    %c0_i32_0 = arith.constant 0 : i32
    %c0_i32_1 = arith.constant 0 : i32
    return %c0_i32, %c0_i32_0 : i32, i32
  }
  func.func @transform_14(%arg0: i32) -> (i32, i32) {
    %c0_i32 = arith.constant 0 : i32
    %c0_i32_0 = arith.constant 0 : i32
    %c0_i32_1 = arith.constant 0 : i32
    return %c0_i32, %c0_i32_0 : i32, i32
  }
  func.func @transform_15(%arg0: i32) -> (i32, i32, i32) {
    %c0_i32 = arith.constant 0 : i32
    %c0_i32_0 = arith.constant 0 : i32
    %c0_i32_1 = arith.constant 0 : i32
    return %arg0, %c0_i32, %c0_i32_0 : i32, i32, i32
  }
}

</mosaic_0001>

<bundles_post_ra>
// kernel: tpu_custom_call.1
= control target key start
LH: loop header
LB: loop body
LE: loop exit
PB: predicated region body
PF: predicated region fallthrough
CT: control target
= control target key end

     0   :  { %s2091_s0 = inlined_call_operand.vmem [shape: f32[2,4,256], index: 0, kind: input, shape index: {}]   ;;  %s2092_s1 = inlined_call_operand.vmem [shape: f32[2,32,1], index: 1, kind: input, shape index: {}]   ;;  %s2093_s2 = inlined_call_operand.vmem [shape: f32[9,256], index: 2, kind: input, shape index: {}]   ;;  %s2094_s3 = inlined_call_operand.vmem [shape: f32[4,1], index: 3, kind: input, shape index: {}]   ;;  %s2095_s4 = inlined_call_operand.vmem [shape: f32[4,1], index: 4, kind: input, shape index: {}]   ;;  %s2096_s5 = inlined_call_operand.vmem [shape: f32[8,36], index: 5, kind: input, shape index: {}]   ;;  %s2097_s6 = inlined_call_operand.vmem [shape: f32[8,1], index: 6, kind: input, shape index: {}]   ;;  %s2098_s7 = inlined_call_operand.vmem [shape: f32[8,32], index: 7, kind: input, shape index: {}]   ;;  %s2099_s8 = inlined_call_operand.vmem [shape: f32[8,1], index: 8, kind: input, shape index: {}]   ;;  %s2100_s9 = inlined_call_operand.vmem [shape: f32[8,1], index: 9, kind: input, shape index: {}]   ;;  %s2101_s10 = inlined_call_operand.vmem [shape: f32[8,1], index: 10, kind: input, shape index: {}]   ;;  %s2102_s11 = inlined_call_operand.vmem [shape: f32[8,72], index: 11, kind: input, shape index: {}]   ;;  %s2103_s12 = inlined_call_operand.vmem [shape: f32[8,1], index: 12, kind: input, shape index: {}]   ;;  %s2104_s13 = inlined_call_operand.vmem [shape: f32[8,4], index: 13, kind: input, shape index: {}]   ;;  %s2105_s14 = inlined_call_operand.vmem [shape: f32[8,1], index: 14, kind: input, shape index: {}]   ;;  %s2106_s15 = inlined_call_operand.hbm [shape: f32[2,8,256], index: 15, kind: output, shape index: {}]  }
   0x1   :  { %2122 = sst [smem:[#allocation8_spill]] %s2091_s0 }
   0x2   :  { %2123 = sst [smem:[#allocation9_spill]] %s2092_s1 }
   0x3   :  { %20 = vsyncpa [#allocation3], 0 }
   0x4   :  { %22 = vsyncpa [#allocation3 + $0x1], 0  ;;  %s1662_s18 = smov 0   ;;  %s1664_s19 = smov 0  }
   0x5   :  { %s1666_s20 = smov 0   ;;  %s1668_s21 = smov 0  }
   0x6 LB: > { %2124 = sst [smem:[#allocation5_spill]] %s1562_s20  ;;  %s1683_s22 = sadd.s32 4294967295, %s1566_s21   ;;  %s1566_s21 = sphi %s1668_s21, %s2137_s21   ;;  %s1562_s20 = sphi %s1666_s20, %s2139_s20   ;;  %s1558_s19 = sphi %s1664_s19, %s2141_s19   ;;  %s1554_s18 = sphi %s1662_s18, %s2140_s18  }
   0x7   : > { %s1338_s23 = sadd.s32 4294967294, %s1566_s21   ;;  %s1687_s24 = sadd.s32 1, %s1566_s21  }
   0x8   : > { %2125 = sst [smem:[#allocation6_spill]] %s1687_s24  ;;  %s360_s25 = sadd.s32 1, %s1562_s20 }
   0x9   : > { %s357_s26 = ssub.s32 %s1566_s21, %s1687_s24  ;;  %p370_p0 = scmp.ne.s32.totalorder %s1562_s20, %s1558_s19 }
   0xa   : > { %p358_p1 = scmp.eq.s32.totalorder %s357_s26, 0  ;;  %p371_p2 = scmp.eq.s32.totalorder %s1683_s22, 1 }
   0xb   : > { %p376_p3 = scmp.ne.s32.totalorder %s1558_s19, %s1554_s18  ;;  %p377_p4 = scmp.eq.s32.totalorder %s1338_s23, 1 }
   0xc   : > { %s1698_s27 = scalar_select %p358_p1, %s1562_s20, %s360_s25  }
   0xd   : > { %p1700_p5 = por %p371_p2, %p370_p0  ;;  %p1704_p6 = por %p377_p4, %p376_p3 }
   0xe   : > { %2126 = sst [smem:[#allocation7_spill]] %s1698_s27  ;;  %p1341_p7 = scmp.ge.s32.totalorder %s1566_s21, 1 }
   0xf   : > { %p450_p8 = scmp.lt.s32.totalorder %s1566_s21, 3 }
  0x11   : > { %p451_p9 = pnand %p1341_p7, %p450_p8 }
  0x12   : > { %p503_p10 = scmp.lt.s32.totalorder (!%p451_p9), %s1683_s22, 1  ;;  %v518_v0 = vld [vmem:[%s2094_s3] sm:$0xf] (!%p451_p9)  ;;  %v1568_v1 = vmov (!%p451_p9), 0   ;;  %vm523_vm0 = vcmask (!%p451_p9), 1043456   ;;  %s2129_s0 = sld [smem:[#allocation8_spill]] (!%p451_p9)  ;;  %v549_v21 = vlaneseq (!%p451_p9) }
  0x13   : > { %454 = sbr.rel (%p451_p9) target bundleno = 1342 (0x53e), region = 80  ;;  %1469 = vset.pattern.permute.xlu1 (!%p451_p9), %v1568_v1  ;;  %1470 = vset.pattern.permute.xlu0 (!%p451_p9), %v1568_v1  ;;  %v519_v2 = vld [vmem:[%s2095_s4] sm:$0xf] (!%p451_p9)  ;;  %v1569_v19 = vmov (!%p451_p9), 839922192   ;;  %s2114_s20 = smov (!%p451_p9), 1  }
  0x14   : > { %567 = vperm.xlu1 (!%p451_p9), %1469, %v518_v0   ;;  %v547_v20 = vunpack.c.l.s4 (!%p451_p9), %v1569_v19  ;;  %v1739_v25 = vshrl.u32 (!%p451_p9), %v549_v21, 7  ;;  %s2120_s27 = smov (!%p451_p9), 17   ;;  %s2116_s30 = smov (!%p451_p9), 15   ;;  %v1578_v45 = vmov (!%p451_p9), 0.0   ;;  %v771_v46 = vld [vmem:[%s2097_s6] sm:$0xff] (!%p451_p9)  ;;  %v1807_v63 = vand.u32 (!%p451_p9), 127, %v549_v21 }
  0x15   : > { %s2112_s16 = smov (!%p451_p9), 127   ;;  %s2110_s23 = smov (!%p451_p9), 112   ;;  %851 = vmatprep.mubr.f32.mxu0 (!%p451_p9), %v1578_v45  ;;  %1155 = vmatprep.mubr.f32.mxu1 (!%p451_p9), %v1578_v45  ;;  %vm777_vm9 = vcmask (!%p451_p9), 293888   ;;  %vm1580_vm10 = vmmov (!%p451_p9), 0   ;;  %vm888_vm11 = vcmask (!%p451_p9), 261120   ;;  %vm1087_vm12 = vcmask (!%p451_p9), 588800  }
  0x16   : > { %v548_v24 = vunpack.c.0.s8 (!%p451_p9), %v547_v20  ;;  %s1576_s25 = smov (!%p451_p9), 113   ;;  %s2130_s1 = sld [smem:[#allocation9_spill]] (!%p451_p9)  ;;  %v646_v1 = vsub.s32 (!%p451_p9), 2, %v1739_v25  ;;  %vm641_vm1 = vcmp.lt.s32.totalorder (!%p451_p9), %v1807_v63, 15  ;;  %vm675_vm2 = vcmp.lt.s32.totalorder (!%p451_p9), %v1807_v63, 127 }
  0x17   : > { %vm709_vm3 = vcmp.lt.s32.totalorder (!%p451_p9), %v1807_v63, 112  ;;  %vm624_vm4 = vcmp.lt.s32.totalorder (!%p451_p9), %v1807_v63, 16  ;;  %vm658_vm5 = vcmp.lt.s32.totalorder (!%p451_p9), %v1807_v63, 1  ;;  %vm607_vm6 = vcmp.lt.s32.totalorder (!%p451_p9), %v1807_v63, 17 }
  0x18   : > { %580 = vperm.xlu1 (!%p451_p9), %1469, %v519_v2   ;;  %v551_v26 = vsub.s32 (!%p451_p9), %v548_v24, %v1739_v25  ;;  %vm692_vm7 = vcmp.lt.s32.totalorder (!%p451_p9), %v1807_v63, 113  ;;  %vm726_vm8 = vcmp.lt.s32.totalorder (!%p451_p9), %v1807_v63, 111  ;;  %v1162_v63 = vld [vmem:[%s2104_s13] sm:$0xff] (!%p451_p9)  ;;  %vm1169_vm13 = vcmask (!%p451_p9), 31744  }
  0x1a   : > { %s1715_s17 = scalar_select %p503_p10, %s1683_s22, 1 }
  0x1c   : > { %s1362_s26 = sshll.u32 %s1715_s17, 3 }
  0x1d   : > { %s507_s24 = scalar_lea.vmem %s2129_s0, %s1362_s26  ;;  %s1577_s26 = smov 111  }
  0x1e   : > { %v1724_v3 = vld [vmem:[%s507_s24] sm:$0xff]  ;;  %s2118_s24 = smov 16  }
  0x1f   : > { %v1728_v4 = vcombine.high %v1724_v3, %v1724_v3  ;;  %v524_v5 = vsel %vm523_vm0, %v1724_v3, 0.0  ;;  %v529_v6 = vmul.f32 %v1724_v3, %v1724_v3 }
  0x21   : > { %v525_v7 = vsel %vm523_vm0, %v1728_v4, 0.0  ;;  %v531_v8 = vcombine.high %v529_v6, %v529_v6  ;;  %v533_v9 = vsel %vm523_vm0, %v529_v6, 0.0  ;;  %v515_v6 = vld [vmem:[%s2093_s2 + $0x8] sm:$0xff] }
  0x22   : > { %v526_v10 = vadd.f32 %v525_v7, %v524_v5  ;;  %v514_v5 = vld [vmem:[%s2093_s2] sm:$0xff]  ;;  %v680_v7 = vsub.s32 5, %v1739_v25 }
  0x23   : > { %v534_v11 = vsel %vm523_vm0, %v531_v8, 0.0 }
  0x24   : > { %527 = vadd.xlane.f32.xlu0 %v526_v10  ;;  %v535_v12 = vadd.f32 %v534_v11, %v533_v9  ;;  %v714_v10 = vsub.s32 7, %v1739_v25  ;;  %v1829_v21 = vrot.slane %v515_v6, %v680_v7 }
  0x26   : > { %v1833_v24 = vrot.slane %v514_v5, %v714_v10 }
  0x28   : > { %536 = vadd.xlane.f32.xlu0 %v535_v12  ;;  %v1819_v12 = vrot.slane %v514_v5, %v646_v1 }
  0x93   : > { %v568_v27 = vpop.permute.xlu1 %567 }
  0x94   : > { %v575_v34 = vrot.slane %v568_v27, %v551_v26 }
  0x97   : > { %v581_v32 = vpop.permute.xlu1 %580 }
  0x98   : > { %v588_v36 = vrot.slane %v581_v32, %v551_v26 }
  0xb1   : > { %v528_v13 = vpop.xlane.xlu0 %527 }
  0xb2   : > { %v538_v14 = vmul.f32 0.00390625, %v528_v13  ;;  %v1821_v13 = vrot.slane %v515_v6, %v646_v1 }
  0xb4   : > { %v540_v16 = vmul.f32 %v538_v14, %v538_v14  ;;  %v552_v28 = vrot.slane %v538_v14, %v551_v26 }
  0xb5   : > { %v537_v15 = vpop.xlane.xlu0 %536 }
  0xb6   : > { %v539_v17 = vmul.f32 0.00390625, %v537_v15  ;;  %v554_v30 = vsub.f32 %v1724_v3, %v552_v28  ;;  %v629_v15 = vsub.s32 1, %v1739_v25 }
  0xb8   : > { %v541_v18 = vsub.f32 %v539_v17, %v540_v16  ;;  %v663_v16 = vsub.s32 3, %v1739_v25  ;;  %v1826_v17 = vrot.slane %v514_v5, %v680_v7 }
  0xba   : > { %v542_v22 = vmax.f32 %v541_v18, 0.0  ;;  %v612_v18 = vsub.s32 0, %v1739_v25  ;;  %v1843_v32 = vrot.slane %v514_v5, %v663_v16 }
  0xbc   : > { %v543_v23 = vadd.f32 1e-05, %v542_v22  ;;  %v697_v22 = vsub.s32 6, %v1739_v25  ;;  %v1848_v25 = vrot.slane %v514_v5, %v612_v18 }
  0xbe   : > { %1472 = vrsqrt.f32 %v543_v23  ;;  %v1883_v1 = vrot.slane %v515_v6, %v697_v22 }
  0xc8   : > { %v1473_v29 = vpop.eup %1472 }
  0xc9   : > { %v562_v31 = vrot.slane %v1473_v29, %v551_v26  ;;  %v1835_v26 = vrot.slane %v515_v6, %v714_v10  ;;  %v1838_v29 = vrot.slane %v514_v5, %v629_v15 }
  0xcb   : > { %v564_v33 = vmul.f32 %v562_v31, %v554_v30  ;;  %v1840_v30 = vrot.slane %v515_v6, %v629_v15 }
  0xcd   : > { %v577_v35 = vmul.f32 %v575_v34, %v564_v33  ;;  %v1845_v33 = vrot.slane %v515_v6, %v663_v16  ;;  %v1850_v34 = vrot.slane %v515_v6, %v612_v18 }
  0xcf   : > { %v590_v37 = vadd.f32 %v588_v36, %v577_v35  ;;  %v1853_v35 = vrot.slane %v514_v5, %v697_v22 }
  0xd1   : > { %v591_v38 = vsub.f32 0.0, %v590_v37 }
  0xd3   : > { %v592_v39 = vmul.f32 1.442695, %v591_v38 }
  0xd5   : > { %1474 = vpow2.f32 %v592_v39 }
  0xdf   : > { %v1475_v40 = vpop.eup %1474 }
  0xe0   : > { %v594_v41 = vadd.f32 1.0, %v1475_v40 }
  0xe2   : > { %1476 = vrcp.f32 %v594_v41 }
  0xec   : > { %v1477_v42 = vpop.eup %1476 }
  0xed   : > { %v1743_v43 = vmul.f32 %v1477_v42, %v590_v37 }
  0xef   : > { %654 = vrot.lane.b32.xlu1 %v1743_v43, %s2114_s20  ;;  %620 = vrot.lane.b32.xlu0 %v1743_v43, %s2118_s24  ;;  %v1751_v44 = vcombine.high %v1743_v43, %v1743_v43 }
  0xf3   : > { %601 = vrot.lane.b32.xlu1 %v1743_v43, %s2120_s27  ;;  %639 = vrot.lane.b32.xlu0 %v1751_v44, %s2116_s30 }
  0xf7   : > { %637 = vrot.lane.b32.xlu1 %v1743_v43, %s2116_s30  ;;  %673 = vrot.lane.b32.xlu0 %v1751_v44, %s2112_s16  ;;  %s2131_s30 = smov 16  }
  0xfb   : > { %671 = vrot.lane.b32.xlu1 %v1743_v43, %s2112_s16  ;;  %707 = vrot.lane.b32.xlu0 %v1751_v44, %s2110_s23  ;;  %s2132_s16 = smov 17  }
  0xff   : > { %705 = vrot.lane.b32.xlu1 %v1743_v43, %s2110_s23  ;;  %690 = vrot.lane.b32.xlu0 %v1751_v44, %s1576_s25  ;;  %s2133_s23 = smov 15  }
 0x103   : > { %724 = vrot.lane.b32.xlu0 %v1751_v44, %s1577_s26  ;;  %622 = vrot.lane.b32.xlu1 %v1751_v44, %s2118_s24  ;;  %s2136_s24 = smov 112  }
 0x107   : > { %656 = vrot.lane.b32.xlu1 %v1751_v44, %s2114_s20  ;;  %s1363_s20 = sshll.u32 %s1715_s17, 5  ;;  %s2134_s17 = smov 1  }
 0x10b   : > { %603 = vrot.lane.b32.xlu1 %v1751_v44, %s2120_s27  ;;  %s512_s27 = scalar_lea.vmem %s2130_s1, %s1363_s20  ;;  %s2135_s20 = smov 127  }
 0x10c   : > { %v1790_v47 = vld [vmem:[%s512_s27] sm:$0xff]  ;;  %v1792_v48 = vld [vmem:[%s512_s27 + $0x8] sm:$0xff]  ;;  %v1794_v49 = vld [vmem:[%s512_s27 + $0x10] sm:$0xff] }
 0x10d   : > { %v863_v50 = vsub.f32 0.0, %v1790_v47  ;;  %v864_v51 = vsub.f32 0.0, %v1792_v48  ;;  %v865_v52 = vsub.f32 0.0, %v1794_v49  ;;  %v1799_v53 = vld [vmem:[%s512_s27 + $0x18] sm:$0xff] }
 0x10e   : > { %v866_v57 = vsub.f32 0.0, %v1799_v53 }
 0x10f   : > { %688 = vrot.lane.b32.xlu1 %v1743_v43, %s1576_s25  ;;  %v867_v55 = vmul.f32 1.442695, %v863_v50  ;;  %v869_v56 = vmul.f32 1.442695, %v864_v51  ;;  %v871_v58 = vmul.f32 1.442695, %v865_v52 }
 0x110   : > { %v873_v61 = vmul.f32 1.442695, %v866_v57 }
 0x111   : > { %1478 = vpow2.f32 %v867_v55 }
 0x112   : > { %1480 = vpow2.f32 %v869_v56 }
 0x113   : > { %722 = vrot.lane.b32.xlu1 %v1743_v43, %s1577_s26  ;;  %1482 = vpow2.f32 %v871_v58 }
 0x114   : > { %1484 = vpow2.f32 %v873_v61 }
 0x117   : > { %774 = vperm.xlu1 %1469, %v771_v46  }
 0x11b   : > { %v1479_v8 = vpop.eup %1478 }
 0x11c   : > { %v1481_v9 = vpop.eup %1480  ;;  %v875_v19 = vadd.f32 1.0, %v1479_v8 }
 0x11d   : > { %v1483_v11 = vpop.eup %1482  ;;  %v876_v23 = vadd.f32 1.0, %v1481_v9 }
 0x11e   : > { %v877_v27 = vadd.f32 1.0, %v1483_v11  ;;  %v1485_v28 = vpop.eup %1484  ;;  %1486 = vrcp.f32 %v875_v19 }
 0x11f   : > { %1488 = vrcp.f32 %v876_v23  ;;  %v878_v38 = vadd.f32 1.0, %v1485_v28 }
 0x120   : > { %1490 = vrcp.f32 %v877_v27 }
 0x121   : > { %1492 = vrcp.f32 %v878_v38 }
 0x161   : > { %v1801_v54 = vpop.permute.xlu1 %654  ;;  %v621_v60 = vpop.permute.xlu0 %620 }
 0x165   : > { %v1804_v59 = vpop.permute.xlu1 %601  ;;  %v640_v0 = vpop.permute.xlu0 %639 }
 0x169   : > { %v638_v62 = vpop.permute.xlu1 %637  ;;  %v674_v20 = vpop.permute.xlu0 %673 }
 0x16a   : > { %v642_v39 = vsel %vm641_vm1, %v638_v62, %v640_v0  ;;  %v643_v40 = vsel %vm641_vm1, %v640_v0, %v638_v62 }
 0x16b   : > { %v653_v5 = vmul.f32 %v1821_v13, %v642_v39 }
 0x16d   : > { %v672_v2 = vpop.permute.xlu1 %671  ;;  %v708_v46 = vpop.permute.xlu0 %707 }
 0x16e   : > { %v676_v41 = vsel %vm675_vm2, %v672_v2, %v674_v20  ;;  %v677_v42 = vsel %vm675_vm2, %v674_v20, %v672_v2  ;;  %v652_v2 = vmul.f32 %v1819_v12, %v643_v40  ;;  %v1487_v20 = vpop.eup %1486 }
 0x16f   : > { %v686_v62 = vmul.f32 %v1826_v17, %v676_v41  ;;  %v687_v0 = vmul.f32 %v1829_v21, %v677_v42  ;;  %v1489_v27 = vpop.eup %1488 }
 0x170   : > { %v1491_v38 = vpop.eup %1490 }
 0x171   : > { %v706_v14 = vpop.permute.xlu1 %705  ;;  %v753_v22 = vrot.slane %v686_v62, 4  ;;  %v754_v23 = vrot.slane %v687_v0, 4  ;;  %v1493_v0 = vpop.eup %1492 }
 0x172   : > { %v710_v51 = vsel %vm709_vm3, %v706_v14, %v708_v46  ;;  %v711_v52 = vsel %vm709_vm3, %v708_v46, %v706_v14  ;;  %v691_v14 = vpop.permute.xlu0 %690 }
 0x173   : > { %v720_v9 = vmul.f32 %v1833_v24, %v710_v51  ;;  %v721_v10 = vmul.f32 %v1835_v26, %v711_v52 }
 0x175   : > { %v623_v31 = vpop.permute.xlu1 %622  ;;  %v759_v46 = vrot.slane %v720_v9, 4  ;;  %v884_v9 = vmul.f32 %v1489_v27, %v1792_v48 }
 0x176   : > { %v625_v36 = vsel %vm624_vm4, %v621_v60, %v623_v31  ;;  %v626_v37 = vsel %vm624_vm4, %v623_v31, %v621_v60 }
 0x177   : > { %v635_v57 = vmul.f32 %v1838_v29, %v626_v37  ;;  %v636_v58 = vmul.f32 %v1840_v30, %v625_v36 }
 0x179   : > { %v657_v50 = vpop.permute.xlu1 %656  ;;  %v741_v15 = vrot.slane %v635_v57, 4  ;;  %v742_v16 = vrot.slane %v636_v58, 4  ;;  %v768_v58 = vsel %vm523_vm0, %v1751_v44, %v754_v23  ;;  %v1927_v44 = vld [vmem:[%s2093_s2 + $0x10] ss:$0 sm:$0xff] }
 0x17a   : > { %v659_v55 = vsel %vm658_vm5, %v1801_v54, %v657_v50  ;;  %v660_v56 = vsel %vm658_vm5, %v657_v50, %v1801_v54  ;;  %v760_v50 = vrot.slane %v721_v10, 4 }
 0x17b   : > { %v669_v60 = vmul.f32 %v1843_v32, %v660_v56  ;;  %v670_v61 = vmul.f32 %v1845_v33, %v659_v55  ;;  %v1911_v55 = vld [vmem:[%s2093_s2 + $0x18] ss:$0 sm:$0xff]  ;;  %v725_v56 = vpop.permute.xlu0 %724 }
 0x17d   : > { %v747_v54 = vrot.slane %v669_v60, 4  ;;  %v748_v7 = vrot.slane %v670_v61, 4  ;;  %v604_v8 = vpop.permute.xlu1 %603  ;;  %v767_v61 = vsel %vm523_vm0, %v1743_v43, %v753_v22 }
 0x17e   : > { %v608_v11 = vsel %vm607_vm6, %v1804_v59, %v604_v8  ;;  %v609_v6 = vsel %vm607_vm6, %v604_v8, %v1804_v59  ;;  %v883_v8 = vmul.f32 %v1487_v20, %v1790_v47  ;;  %v597_v47 = vld [vmem:[%s2096_s5] sm:$0xff] }
 0x17f   : > { %v618_v18 = vmul.f32 %v1848_v25, %v609_v6  ;;  %v619_v19 = vmul.f32 %v1850_v34, %v608_v11  ;;  %v766_v36 = vsel %vm523_vm0, %v653_v5, %v748_v7  ;;  %v765_v37 = vsel %vm523_vm0, %v652_v2, %v747_v54 }
 0x180   : > { %v1390_v48 = vpack.c.bf16 %v884_v9, %v883_v8  ;;  %v885_v11 = vmul.f32 %v1491_v38, %v1794_v49  ;;  %v886_v6 = vmul.f32 %v1493_v0, %v1799_v53 }
 0x181   : > { %v689_v28 = vpop.permute.xlu1 %688  ;;  %v764_v31 = vsel %vm523_vm0, %v619_v19, %v742_v16  ;;  %v763_v59 = vsel %vm523_vm0, %v618_v18, %v741_v15  ;;  %v862_v16 = vld [vmem:[%s2098_s7] sm:$0xff] }
 0x182   : > { %v693_v39 = vsel %vm692_vm7, %v689_v28, %v691_v14  ;;  %v694_v40 = vsel %vm692_vm7, %v691_v14, %v689_v28  ;;  %v1381_v41 = vpack.c.bf16 %v766_v36, %v764_v31  ;;  %v1383_v42 = vpack.c.bf16 %v765_v37, %v763_v59  ;;  %v887_v18 = vld [vmem:[%s2099_s8] sm:$0xff] }
 0x183   : > { %v703_v51 = vmul.f32 %v1853_v35, %v693_v39  ;;  %v704_v52 = vmul.f32 %v1883_v1, %v694_v40  ;;  %v1579_v14 = vmov 0.0|0.0   ;;  %v1393_v15 = vpack.c.bf16 %v886_v6, %v885_v11 }
 0x184   : > { %1382 = vmatprep.subr.bf16.mxu0 %v1381_v41  ;;  %v969_v41 = vld [vmem:[%s2100_s9] sm:$0xff] }
 0x185   : > { %1384 = vmatpush1.bf16.msra.mxu0 %v1383_v42  ;;  %v723_v57 = vpop.permute.xlu1 %722  ;;  %v770_v60 = vsel %vm523_vm0, %v704_v52, %v760_v50  ;;  %v769_v62 = vsel %vm523_vm0, %v703_v51, %v759_v46  ;;  %v970_v42 = vld [vmem:[%s2101_s10] sm:$0xff] }
 0x186   : > { %v728_v2 = vsel %vm726_vm8, %v725_v56, %v723_v57  ;;  %v1385_v5 = vpack.c.bf16 %v770_v60, %v768_v58  ;;  %v1387_v54 = vpack.c.bf16 %v769_v62, %v767_v61  ;;  %v727_v43 = vsel %vm726_vm8, %v723_v57, %v725_v56 }
 0x187   : > { %v738_v7 = vmul.f32 %v1911_v55, %v728_v2  ;;  %v737_v10 = vmul.f32 %v1927_v44, %v727_v43 }
 0x188   : > { %1386 = vmatprep.subr.bf16.mxu0 %v1385_v5 }
 0x189   : > { %1388 = vmatpush1.bf16.msra.mxu0 %v1387_v54 }
 0x18a   : > { %1349 = vmatprep.subr.msk.mxu0 %vm523_vm0, %v738_v7 }
 0x18d   : > { %1350 = vmatpush1.msk.msra.mxu0 %vm523_vm0, %v737_v10 }
 0x18e   : > { %1351 = vmatmul.mubr.msk.f32.vlgmr.msra.gmra.mrb[0].mxu0 %vm777_vm9, %v597_v47  ;;  %1389 = vmatprep.subr.bf16.mxu0 %v1579_v14 }
 0x18f   : > { %1391 = vmatpush3.bf16.msra.mxu0 %v1390_v48  ;;  %1378 = vmatprep.mubr.msk.f32.mxu0 %vm1580_vm10, %v1578_v45 }
 0x190   : > { %1392 = vmatprep.subr.bf16.mxu0 %v1579_v14 }
 0x193   : > { %1394 = vmatpush3.bf16.msra.mxu0 %v1393_v15 }
 0x196   : > { %1379 = vmatmul.mubr.msk.f32.vlgmr.msra.gmra.mrb[2].mxu0 %vm888_vm11, %v862_v16  ;;  %v775_v23 = vpop.permute.xlu1 %774 }
 0x261   : > { %v853_v49 = vpop.f32.mrb[0].mxu0 }
 0x262   : > { %v855_v53 = vpop.f32.mrb[1].mxu0  ;;  %v854_v27 = vadd.f32 %v853_v49, %v775_v23 }
 0x263   : > { %v856_v28 = vadd.f32 %v855_v53, %v775_v23  ;;  %v1163_v23 = vld [vmem:[%s2105_s14] sm:$0xff] }
 0x269   : > { %v958_v19 = vpop.f32.mrb[2].mxu0 }
 0x26a   : > { %v959_v20 = vadd.f32 %v958_v19, %v887_v18  ;;  %v1380_v22 = vpop.f32.mrb[3].mxu0 }
 0x26b   : > { %v1081_v22 = vld [vmem:[%s2103_s12] sm:$0xff] }
 0x26c   : > { %964 = vperm.xlu0 %1470, %v959_v20  }
 0x2eb   : > { %v965_v31 = vpop.permute.xlu0 %964 }
 0x2ec   : > { %v967_v36 = vadd.f32 %v965_v31, %v854_v27  ;;  %v968_v59 = vadd.f32 %v965_v31, %v856_v28 }
 0x2ee   : > { %v971_v37 = vadd.f32 %v968_v59, %v967_v36  ;;  %v974_v38 = vmul.f32 %v967_v36, %v967_v36  ;;  %v975_v39 = vmul.f32 %v968_v59, %v968_v59 }
 0x2f0   : > { %972 = vadd.xlane.f32.xlu1 %v971_v37  ;;  %v976_v40 = vadd.f32 %v975_v39, %v974_v38 }
 0x2f2   : > { %977 = vadd.xlane.f32.xlu0 %v976_v40 }
 0x301   : > { %992 = vperm.xlu1 %1469, %v969_v41  }
 0x308   : > { %999 = vperm.xlu0 %1470, %v970_v42  }
 0x37d   : > { %v973_v46 = vpop.xlane.xlu1 %972 }
 0x37e   : > { %v979_v50 = vmul.f32 0.00390625, %v973_v46 }
 0x37f   : > { %v978_v51 = vpop.xlane.xlu0 %977 }
 0x380   : > { %v980_v52 = vmul.f32 0.00390625, %v978_v51  ;;  %v981_v56 = vmul.f32 %v979_v50, %v979_v50  ;;  %v986_v61 = vsub.f32 %v967_v36, %v979_v50  ;;  %v987_v62 = vsub.f32 %v968_v59, %v979_v50 }
 0x381   : > { %v993_v54 = vpop.permute.xlu1 %992 }
 0x382   : > { %v982_v57 = vsub.f32 %v980_v52, %v981_v56 }
 0x384   : > { %v983_v58 = vmax.f32 %v982_v57, 0.0 }
 0x386   : > { %v984_v60 = vadd.f32 1e-05, %v983_v58 }
 0x387   : > { %v1000_v9 = vpop.permute.xlu0 %999 }
 0x388   : > { %1494 = vrsqrt.f32 %v984_v60 }
 0x392   : > { %v1495_v0 = vpop.eup %1494 }
 0x393   : > { %v988_v2 = vmul.f32 %v1495_v0, %v986_v61  ;;  %v989_v5 = vmul.f32 %v1495_v0, %v987_v62 }
 0x395   : > { %v995_v7 = vmul.f32 %v993_v54, %v988_v2  ;;  %v996_v8 = vmul.f32 %v993_v54, %v989_v5 }
 0x397   : > { %v1002_v43 = vadd.f32 %v1000_v9, %v995_v7  ;;  %v1003_v10 = vadd.f32 %v1000_v9, %v996_v8 }
 0x399   : > { %v1004_v47 = vsub.f32 0.0, %v1002_v43  ;;  %v1005_v48 = vsub.f32 0.0, %v1003_v10 }
 0x39b   : > { %v1006_v11 = vmul.f32 1.442695, %v1004_v47  ;;  %v1008_v6 = vmul.f32 1.442695, %v1005_v48 }
 0x39d   : > { %1496 = vpow2.f32 %v1006_v11 }
 0x39e   : > { %1498 = vpow2.f32 %v1008_v6 }
 0x3a7   : > { %v1497_v14 = vpop.eup %1496 }
 0x3a8   : > { %v1499_v15 = vpop.eup %1498  ;;  %v1010_v16 = vadd.f32 1.0, %v1497_v14 }
 0x3a9   : > { %v1011_v49 = vadd.f32 1.0, %v1499_v15 }
 0x3aa   : > { %1500 = vrcp.f32 %v1010_v16 }
 0x3ab   : > { %1502 = vrcp.f32 %v1011_v49 }
 0x3b4   : > { %v1501_v53 = vpop.eup %1500 }
 0x3b5   : > { %v1952_v18 = vmul.f32 %v1501_v53, %v1002_v43  ;;  %v1503_v19 = vpop.eup %1502 }
 0x3b6   : > { %v1015_v20 = vmul.f32 %v1503_v19, %v1003_v10 }
 0x3b7   : > { %1025 = vrot.lane.b32.xlu0 %v1952_v18, %s2131_s30  ;;  %1017 = vrot.lane.b32.xlu1 %v1952_v18, %s2132_s16 }
 0x3bb   : > { %1033 = vrot.lane.b32.xlu0 %v1952_v18, %s2133_s23  ;;  %1019 = vrot.lane.b32.xlu1 %v1015_v20, %s2132_s16 }
 0x3bf   : > { %1041 = vrot.lane.b32.xlu0 %v1952_v18, %s2134_s17  ;;  %1027 = vrot.lane.b32.xlu1 %v1015_v20, %s2131_s30  ;;  %s1364_s30 = sshll.u32 %s1683_s22, 8 }
 0x3c3   : > { %1049 = vrot.lane.b32.xlu0 %v1952_v18, %s2135_s20  ;;  %1035 = vrot.lane.b32.xlu1 %v1015_v20, %s2133_s23 }
 0x3c7   : > { %1057 = vrot.lane.b32.xlu0 %v1952_v18, %s1576_s25  ;;  %1043 = vrot.lane.b32.xlu1 %v1015_v20, %s2134_s17  ;;  %s2049_s17 = scalar_lea.hbm %s2106_s15, %s1364_s30 }
 0x3cb   : > { %1065 = vrot.lane.b32.xlu0 %v1952_v18, %s2136_s24  ;;  %1051 = vrot.lane.b32.xlu1 %v1015_v20, %s2135_s20 }
 0x3cf   : > { %1073 = vrot.lane.b32.xlu0 %v1952_v18, %s1577_s26  ;;  %1059 = vrot.lane.b32.xlu1 %v1015_v20, %s1576_s25 }
 0x3d3   : > { %1084 = vperm.xlu0 %1470, %v1081_v22   ;;  %1067 = vrot.lane.b32.xlu1 %v1015_v20, %s2136_s24  ;;  %s500_s24 = sand.u32 1, %s1558_s19  }
 0x3d4   : > { %s1342_s27 = sshll.u32 %s500_s24, 4  ;;  %s1253_s20 = scalar_lea.sflag [#allocation3], %s500_s24 }
 0x3d5   : > { %s502_s16 = scalar_lea.vmem [#allocation2], %s1342_s27  ;;  %s1581_s27 = smov [#allocation2]  }
 0x3d6   : > { %s1267_s23 = sshll.u32 %s502_s16, 4  ;;  %s1508_s0 = sshll.u32 %s1581_s27, 4  ;;  %s2051_s23 = int_to_ptr.vmem [resolvable:$true] %s1267_s23  ;;  %s1509_s0 = int_to_ptr.vmem [resolvable:$false] %s1508_s0 }
 0x3d7   : > { %1075 = vrot.lane.b32.xlu1 %v1015_v20, %s1577_s26  ;;  %s1504_s22 = scalar_lea.vmem %s2051_s23, 256  ;;  %s1510_s1 = scalar_lea.vmem %s1509_s0, 512 }
 0x3d8   : > { %p1505_p11 = scmp.ne.s32.totalorder %s2051_s23, %s1504_s22  ;;  %p1511_p0 = scmp.lt.s32.totalorder %s2051_s23, %s1509_s0 }
 0x3d9   : > { %p1512_p1 = scmp.lt.s32.totalorder %s1510_s1, %s1504_s22 }
 0x3da   : > { %p1506_p12 = pnand %p1505_p11, %p1700_p5 }
 0x3db   : > { %1166 = vperm.xlu1 %1469, %v1163_v23   ;;  %p1513_p2 = por %p1512_p1, %p1511_p0 }
 0x3dc   : > { %p1507_p13 = pneg %p1506_p12 }
 0x3de   : > { %p1514_p3 = pnand %p1513_p2, %p1507_p13 }
 0x429   : > { %v1026_v27 = vpop.permute.xlu0 %1025  ;;  %v1018_v28 = vpop.permute.xlu1 %1017 }
 0x42d   : > { %v1034_v31 = vpop.permute.xlu0 %1033  ;;  %v1020_v36 = vpop.permute.xlu1 %1019 }
 0x42e   : > { %v1021_v59 = vsel %vm607_vm6, %v1018_v28, %v1020_v36  ;;  %v1022_v37 = vsel %vm607_vm6, %v1020_v36, %v1018_v28 }
 0x42f   : > { %v1023_v42 = vmul.f32 %v1022_v37, %v1848_v25  ;;  %v1024_v50 = vmul.f32 %v1021_v59, %v1850_v34 }
 0x431   : > { %v1042_v38 = vpop.permute.xlu0 %1041  ;;  %v1028_v39 = vpop.permute.xlu1 %1027 }
 0x432   : > { %v1029_v40 = vsel %vm624_vm4, %v1026_v27, %v1028_v39  ;;  %v1030_v41 = vsel %vm624_vm4, %v1028_v39, %v1026_v27 }
 0x433   : > { %v1031_v46 = vmul.f32 %v1030_v41, %v1838_v29  ;;  %v1032_v51 = vmul.f32 %v1029_v40, %v1840_v30 }
 0x435   : > { %v1036_v52 = vpop.permute.xlu1 %1035  ;;  %v1395_v56 = vpack.c.bf16 %v1032_v51, %v1024_v50  ;;  %v1397_v57 = vpack.c.bf16 %v1031_v46, %v1023_v42  ;;  %v1050_v58 = vpop.permute.xlu0 %1049 }
 0x436   : > { %v1037_v60 = vsel %vm641_vm1, %v1034_v31, %v1036_v52  ;;  %v1038_v61 = vsel %vm641_vm1, %v1036_v52, %v1034_v31 }
 0x437   : > { %1396 = vmatprep.subr.bf16.mxu1 %v1395_v56  ;;  %v1039_v30 = vmul.f32 %v1038_v61, %v1819_v12  ;;  %v1040_v34 = vmul.f32 %v1037_v60, %v1821_v13 }
 0x438   : > { %1398 = vmatpush1.bf16.msra.mxu1 %v1397_v57 }
 0x439   : > { %v1044_v62 = vpop.permute.xlu1 %1043  ;;  %v1058_v5 = vpop.permute.xlu0 %1057 }
 0x43a   : > { %v1045_v29 = vsel %vm658_vm5, %v1042_v38, %v1044_v62  ;;  %v1046_v25 = vsel %vm658_vm5, %v1044_v62, %v1042_v38 }
 0x43b   : > { %v1047_v0 = vmul.f32 %v1046_v25, %v1843_v32  ;;  %v1048_v2 = vmul.f32 %v1045_v29, %v1845_v33 }
 0x43d   : > { %v1052_v54 = vpop.permute.xlu1 %1051  ;;  %v1399_v7 = vpack.c.bf16 %v1048_v2, %v1040_v34  ;;  %v1401_v8 = vpack.c.bf16 %v1047_v0, %v1039_v30  ;;  %v1066_v47 = vpop.permute.xlu0 %1065 }
 0x43e   : > { %v1053_v9 = vsel %vm675_vm2, %v1050_v58, %v1052_v54  ;;  %v1054_v43 = vsel %vm675_vm2, %v1052_v54, %v1050_v58 }
 0x43f   : > { %v1055_v10 = vmul.f32 %v1053_v9, %v1826_v17  ;;  %v1056_v12 = vmul.f32 %v1054_v43, %v1829_v21  ;;  %1400 = vmatprep.subr.bf16.mxu1 %v1399_v7 }
 0x440   : > { %1402 = vmatpush1.bf16.msra.mxu1 %v1401_v8 }
 0x441   : > { %v1060_v13 = vpop.permute.xlu1 %1059  ;;  %v1403_v32 = vpack.c.bf16 %v1056_v12, %v1015_v20  ;;  %v1405_v33 = vpack.c.bf16 %v1055_v10, %v1952_v18  ;;  %v1074_v53 = vpop.permute.xlu0 %1073 }
 0x442   : > { %v1061_v48 = vsel %vm692_vm7, %v1058_v5, %v1060_v13  ;;  %v1062_v11 = vsel %vm692_vm7, %v1060_v13, %v1058_v5 }
 0x443   : > { %1404 = vmatprep.subr.bf16.mxu1 %v1403_v32  ;;  %v1063_v14 = vmul.f32 %v1061_v48, %v1853_v35  ;;  %v1064_v15 = vmul.f32 %v1062_v11, %v1883_v1 }
 0x444   : > { %1406 = vmatpush1.bf16.msra.mxu1 %v1405_v33 }
 0x445   : > { %v1068_v6 = vpop.permute.xlu1 %1067 }
 0x446   : > { %v1069_v17 = vsel %vm709_vm3, %v1066_v47, %v1068_v6  ;;  %v1070_v21 = vsel %vm709_vm3, %v1068_v6, %v1066_v47 }
 0x447   : > { %v1071_v16 = vmul.f32 %v1069_v17, %v1833_v24  ;;  %v1072_v49 = vmul.f32 %v1070_v21, %v1835_v26  ;;  %v1016_v26 = vld [vmem:[%s2102_s11] sm:$0xff] }
 0x449   : > { %v1076_v18 = vpop.permute.xlu1 %1075  ;;  %v1407_v19 = vpack.c.bf16 %v1072_v49, %v1064_v15  ;;  %v1409_v20 = vpack.c.bf16 %v1071_v16, %v1063_v14 }
 0x44a   : > { %v1078_v22 = vsel %vm726_vm8, %v1076_v18, %v1074_v53  ;;  %v1077_v23 = vsel %vm726_vm8, %v1074_v53, %v1076_v18 }
 0x44b   : > { %v1080_v27 = vmul.f32 %v1911_v55, %v1078_v22  ;;  %1408 = vmatprep.subr.bf16.mxu1 %v1407_v19  ;;  %v1079_v24 = vmul.f32 %v1927_v44, %v1077_v23 }
 0x44c   : > { %1410 = vmatpush1.bf16.msra.mxu1 %v1409_v20 }
 0x44d   : > { %1107 = vmatprep.subr.mxu1 %v1080_v27 }
 0x450   : > { %1108 = vmatpush1.msra.mxu1 %v1079_v24 }
 0x451   : > { %1353 = vmatmul.mubr.msk.f32.vlgmr.msra.gmra.mrb[0].mxu1 %vm1087_vm12, %v1016_v26  ;;  %1354 = vmatprep.subr.msk.mxu1 %vm523_vm0, %v1728_v4 }
 0x452   : > { %1355 = vmatpush1.msk.msra.mxu1 %vm523_vm0, %v1724_v3  ;;  %1241 = vmatprep.mubr.f32.mxu1 %v1578_v45  ;;  %v1085_v1 = vpop.permute.xlu0 %1084 }
 0x459   : > { %1356 = vmatmul.mubr.msk.f32.vlgmr.msra.gmra.mrb[0].mxu1 %vm1169_vm13, %v1162_v63 }
 0x45a   : > { %v1167_v35 = vpop.permute.xlu1 %1166 }
 0x45b   : > { %v1411_v55 = vadd.f32 %v1167_v35, %v1085_v1 }
 0x52c   : > { %v1243_v4 = vpop.f32.mrb[0].mxu1 }
 0x52d   : > { %v1412_v44 = vadd.f32 %v1411_v55, %v1243_v4  ;;  %v1245_v3 = vpop.f32.mrb[1].mxu1 }
 0x52e   : > { %v1414_v28 = vadd.f32 %v1411_v55, %v1245_v3 }
 0x52f   : > { %1250 = vst [vmem:[%s502_s16] sm:$0xff] %v1412_v44 }
 0x530   : > { %1251 = vst [vmem:[%s502_s16 + $0x8] sm:$0xff] %v1414_v28 }
 0x531   : > { %1517 = shalt.err (!%p1514_p3)
}
 0x532   : > { %s1518_s24 = scalar_lea.hbm %s2049_s17, 256  ;;  %s1522_s25 = scalar_lea.hbm %s2106_s15, 512 }
 0x533   : > { %p1519_p4 = scmp.ne.s32.totalorder %s2049_s17, %s1518_s24  ;;  %p1523_p9 = scmp.lt.u32.totalorder %s2049_s17, %s2106_s15 }
 0x534   : > { %p1524_p10 = scmp.lt.u32.totalorder %s1522_s25, %s1518_s24  ;;  %p1526_p12 = scmp.lt.u32.totalorder %s1518_s24, %s2049_s17 }
 0x535   : > { %p1520_p7 = pnand %p1519_p4, %p1700_p5 }
 0x536   : > { %p1525_p11 = por %p1524_p10, %p1523_p9 }
 0x537   : > { %p1521_p8 = pneg %p1520_p7 }
 0x538   : > { %p1527_p13 = por %p1526_p12, %p1525_p11 }
 0x53a   : > { %p1528_p0 = pnand %p1527_p13, %p1521_p8 }
 0x53c   : > { %1531 = shalt.err (!%p1528_p0)
}
 0x53d   : > { %1417 = dma.vmem_to_hbm [thread:$0]  (%p1700_p5), %s2051_s23, 256, %s2049_s17, %s1253_s20  }
 0x53e PF: > { %p1423_p1 = scmp.ge.s32.totalorder %s1566_s21, 2  ;;  %s1279_s1 = sand.u32 1, %s1554_s18  }
 0x53f   : > { %s1280_s22 = scalar_lea.sflag [#allocation3], %s1279_s1 }
 0x540   : > { %p1420_p2 = pnand %p1423_p1, %p1704_p6 }
 0x542   : > { %1549 = dma.done.wait (!%p1420_p2), %s1280_s22, 256  }
 0x543   : > { %1551 = vsyncadd (!%p1420_p2), %s1280_s22, 4294967040  ;;  %s2137_s21 = sld [smem:[#allocation6_spill]]  ;;  %s2138_s27 = sld [smem:[#allocation5_spill]] }
 0x544   : > { %s2139_s20 = sld [smem:[#allocation7_spill]]  ;;  %s2140_s18 = smov %s1558_s19 }
 0x549   : > { %p25_p3 = scmp.ge.s32.totalorder %s2137_s21, 4   ;;  %s2141_s19 = smov %s2138_s27 }
 0x54b   :  { %27 = sbr.rel (!%p25_p3) target bundleno = 6 (0x6), region = 118 }
 0x552   :  { %1285 = vsyncpa [#allocation3], 1 }
 0x553   :  { %1287 = vsyncpa [#allocation3 + $0x1], 1 }

</bundles_post_ra>
